<compile_context>
chip_gen: v6e
topology: v6e:2x2x1
jax: 0.10.0
libtpu: 0.0.40
codegen_flags: <defaults>
</compile_context>

<pallas_src>
import functools

import jax
import jax.numpy as jnp
from jax import lax
from jax.experimental import pallas as pl
from jax.experimental.pallas import tpu as pltpu


# --------------------------------------------------------------------------- #
# Kernel
# --------------------------------------------------------------------------- #
def _pool_linear_kernel(x_ref, w_ref, b_ref, o_ref, acc_ref, *,
                        hw_total, inv_hw, lane_w, needs_mask):
    # x_ref  : (TN, C1, T_hw)   slice of the (N, C1, H*W) input
    # w_ref  : (C1, C2p) bf16   folded conv weight (centre tap), C2 padded
    # b_ref  : (1, C2p)  f32    conv bias, padded
    # o_ref  : (1, TN, C2p)     output rows for this batch tile
    # acc_ref: (TN, C1, lane_w) f32 lane-partial channel sums (VMEM scratch)
    t = pl.program_id(1)
    tn, c1, t_hw = x_ref.shape
    num_groups = t_hw // lane_w

    @pl.when(t == 0)
    def _init():
        acc_ref[...] = jnp.zeros_like(acc_ref)

    base = t * t_hw
    if needs_mask:
        lane = lax.broadcasted_iota(jnp.int32, (tn, c1, lane_w), 2)

    def _accum(g):
        start = g * lane_w
        if not isinstance(g, int):
            start = pl.multiple_of(start, lane_w)
        xg = x_ref[:, :, pl.ds(start, lane_w)].astype(jnp.float32)
        if needs_mask:
            xg = jnp.where(base + start + lane < hw_total, xg, 0.0)
        acc_ref[...] += xg          # pure VPU adds; XLU reduce deferred

    if num_groups <= 8:
        for g in range(num_groups):
            _accum(g)
    else:
        def _body(g, carry):
            _accum(g)
            return carry
        lax.fori_loop(0, num_groups, _body, 0, unroll=4)

    @pl.when(t == pl.num_programs(1) - 1)
    def _finalize():
        pooled = jnp.sum(acc_ref[...], axis=-1) * inv_hw          # (TN, C1) f32
        y = jnp.dot(pooled.astype(w_ref.dtype), w_ref[...],
                    preferred_element_type=jnp.float32)           # (TN, C2p)
        o_ref[0] = (y + b_ref[...]).astype(o_ref.dtype)


# --------------------------------------------------------------------------- #
# Tiling helpers
# --------------------------------------------------------------------------- #
def _tpu_tuning():
    """(per-input-buffer tile budget, vmem_limit cap) per TPU generation."""
    kind = ""
    try:
        kind = jax.devices()[0].device_kind.lower()
    except Exception:  # noqa: BLE001 - tuning only, never fatal
        pass
    if "v5" in kind:
        return 3 << 20, 96 << 20      # v5e: 2-4 MiB tiles already ~roofline
    if "v6" in kind:
        return 7 << 20, 100 << 20     # v6e: 128 MiB VMEM -> bigger tiles
    return 4 << 20, 48 << 20          # v7x / unknown: 64 MiB physical, be careful


def _pick_batch_tile(n):
    """Largest divisor of n that keeps the parallel grid axis >= 2 (v7x 2 TCs)."""
    if n <= 1:
        # TODO(synk): for N==1 on v7x, split the HW reduction across a size-2
        # parallel axis (partial pooled sums combined in an epilogue) so the
        # second TensorCore is not idle.
        return 1
    cap = min(8, n // 2)
    for d in range(cap, 0, -1):
        if n % d == 0:
            return d
    return 1


def _pick_hw_tile(hw, c1, tn, itemsize, target_bytes):
    """Largest 128-multiple T_hw whose (TN, C1, T_hw) slab fits target_bytes."""
    if hw < 128:
        return hw                     # block == full dim (no 128 alignment needed)
    hw_pad = ((hw + 127) // 128) * 128
    max_groups = hw_pad // 128
    bytes_per_group = tn * c1 * 128 * itemsize
    groups = max(1, min(max_groups, target_bytes // max(bytes_per_group, 1)))
    return int(groups * 128)


# --------------------------------------------------------------------------- #
# Fused pool + 1x1-conv for a single input tensor
# --------------------------------------------------------------------------- #
def _fused_pool_linear(x_nchw, w_c1c2, bias_c2):
    """flatten(conv1x1(adaptive_avg_pool(x))) -> (N, C2) float32."""
    N, C1, H, W = x_nchw.shape
    C2 = w_c1c2.shape[1]
    HW = H * W
    x3 = x_nchw.reshape(N, C1, HW)            # metadata-only reshape
    itemsize = x3.dtype.itemsize

    # Lane-dense weight / bias / output: pad C2 to a multiple of 128.
    C2p = max(128, ((C2 + 127) // 128) * 128)
    w_p = jnp.pad(w_c1c2.astype(jnp.float32),
                  ((0, 0), (0, C2p - C2))).astype(jnp.bfloat16)
    b_p = jnp.pad(bias_c2.astype(jnp.float32), (0, C2p - C2)).reshape(1, C2p)

    target_bytes, vmem_cap = _tpu_tuning()
    TN = _pick_batch_tile(N)
    T_hw = _pick_hw_tile(HW, C1, TN, itemsize, target_bytes)

    # Accurate VMEM accounting: double-buffered input/output, single-buffered
    # constants, one accumulator scratch.  Shrink T_hw if it cannot fit.
    def _need(t_hw):
        return (2 * TN * C1 * t_hw * itemsize                 # input  (2 bufs)
                + 2 * TN * C2p * 4                            # output (2 bufs)
                + C1 * C2p * w_p.dtype.itemsize               # weight (1 buf)
                + C2p * 4                                     # bias   (1 buf)
                + TN * C1 * min(t_hw, 128) * 4)               # accumulator
    while _need(T_hw) + (4 << 20) > vmem_cap and T_hw > 128:
        T_hw = max(128, ((T_hw // 2) // 128) * 128)

    lane_w = 128 if T_hw % 128 == 0 else T_hw
    n_hw = pl.cdiv(HW, T_hw)
    needs_mask = (HW % T_hw) != 0
    grid = (N // TN, n_hw)
    vmem_limit = int(min(max(_need(T_hw) + (4 << 20), 16 << 20), vmem_cap))

    kernel = functools.partial(_pool_linear_kernel,
                               hw_total=HW,
                               inv_hw=float(1.0 / HW),
                               lane_w=lane_w,
                               needs_mask=needs_mask)

    out3 = pl.pallas_call(
        kernel,
        out_shape=jax.ShapeDtypeStruct((N // TN, TN, C2p), jnp.float32),
        grid_spec=pltpu.PrefetchScalarGridSpec(
            num_scalar_prefetch=0,
            grid=grid,
            in_specs=[
                pl.BlockSpec((TN, C1, T_hw), lambda n, t: (n, 0, t)),
                # Grid-invariant constants: single-buffered to save VMEM.
                pl.BlockSpec((C1, C2p), lambda n, t: (0, 0),
                             pipeline_mode=pl.Buffered(1)),
                pl.BlockSpec((1, C2p), lambda n, t: (0, 0),
                             pipeline_mode=pl.Buffered(1)),
            ],
            out_specs=pl.BlockSpec((1, TN, C2p), lambda n, t: (n, 0, 0)),
            scratch_shapes=[pltpu.VMEM((TN, C1, lane_w), jnp.float32)],
        ),
        compiler_params=pltpu.CompilerParams(
            dimension_semantics=("parallel", "arbitrary"),
            vmem_limit_bytes=vmem_limit),
    )(x3, w_p, b_p)

    return out3.reshape(N, C2p)[:, :C2]


# --------------------------------------------------------------------------- #
# Classify.forward
# --------------------------------------------------------------------------- #
def classify_forward(x, conv_weight, conv_bias, *, s=1, g=1, p=None):
    """Pallas equivalent of Classify.forward.

    x           : (N, C1, H, W) array, or a list of such arrays (pooled
                  features are concatenated along channels, as in PyTorch).
    conv_weight : (C2, C1_total, K, K) with K odd; on the 1x1 pooled input
                  with p = K//2 only the centre tap contributes.
    conv_bias   : (C2,)
    returns     : (N, C2) float32
    """
    assert s == 1, "only stride 1 implemented"      # TODO(synk): strided conv head
    assert g == 1, "only groups=1 implemented"      # TODO(synk): grouped conv head
    C2, C1_total, KH, KW = conv_weight.shape
    assert KH % 2 == 1 and KW % 2 == 1, "even kernel sizes not supported"
    if p is not None:
        assert p == KH // 2, "only autopad(k) padding supported"

    # 1x1 pooled input + p = k//2  =>  conv folds to a linear on the centre tap.
    w2d = conv_weight[:, :, KH // 2, KW // 2]        # (C2, C1_total)

    xs = list(x) if isinstance(x, (list, tuple)) else [x]
    out = None
    off = 0
    for i, xi in enumerate(xs):
        c1_i = xi.shape[1]
        wi = jnp.transpose(w2d[:, off:off + c1_i])   # (c1_i, C2), one-time fold
        bi = conv_bias if i == 0 else jnp.zeros_like(conv_bias)
        yi = _fused_pool_linear(xi, wi, bi)
        out = yi if out is None else out + yi
        off += c1_i
    assert off == C1_total, "channel mismatch between inputs and conv weight"
    return out


if __name__ == "__main__":
    key = jax.random.PRNGKey(0)
    kx, kw, kb, kx2, kw2 = jax.random.split(key, 5)

    # Classify(c1=4, c2=8) on a (2, 4, 16, 16) input.
    N, C1, C2, H, W = 2, 4, 8, 16, 16
    x = jax.random.normal(kx, (N, C1, H, W), dtype=jnp.float32)
    weight = 0.1 * jax.random.normal(kw, (C2, C1, 1, 1), dtype=jnp.float32)
    bias = 0.1 * jax.random.normal(kb, (C2,), dtype=jnp.float32)

    out = classify_forward(x, weight, bias)
    out = jax.block_until_ready(out)

    pooled = jnp.mean(x, axis=(2, 3))                       # (N, C1)
    ref = pooled @ weight[:, :, 0, 0].T + bias              # (N, C2)
    assert out.shape == (N, C2)
    # bf16 folded weight in the MXU -> slightly looser tolerance than pure f32.
    assert jnp.allclose(out, ref, atol=5e-3, rtol=5e-3), "mismatch (single input)"

    # List input path: pooled features concatenated along channels.
    x2 = jax.random.normal(kx2, (N, C1, H // 2, W // 2), dtype=jnp.float32)
    weight2 = 0.1 * jax.random.normal(kw2, (C2, 2 * C1, 1, 1), dtype=jnp.float32)
    out_list = classify_forward([x, x2], weight2, bias)
    out_list = jax.block_until_ready(out_list)

    pooled_cat = jnp.concatenate(
        [jnp.mean(x, axis=(2, 3)), jnp.mean(x2, axis=(2, 3))], axis=1)
    ref_list = pooled_cat @ weight2[:, :, 0, 0].T + bias
    assert out_list.shape == (N, C2)
    assert jnp.allclose(out_list, ref_list, atol=5e-3, rtol=5e-3), "mismatch (list input)"

    print("KERNEL_OK")
</pallas_src>

<mosaic_0001>
module attributes {stable_mosaic.version = 11 : i64} {
  func.func @_pool_linear_kernel(%arg0: i32, %arg1: i32, %arg2: memref<1x4x256xf32, #tpu.memory_space<vmem>>, %arg3: memref<4x128xbf16, #tpu.memory_space<vmem>>, %arg4: memref<1x128xf32, #tpu.memory_space<vmem>>, %arg5: memref<1x1x128xf32, #tpu.memory_space<vmem>>, %arg6: memref<1x4x128xf32, #tpu.memory_space<vmem>>) attributes {dimension_semantics = [#tpu.dimension_semantics<parallel>, #tpu.dimension_semantics<arbitrary>], iteration_bounds = array<i64: 2, 1>, scalar_prefetch = 0 : i64, scratch_operands = 1 : i64, tpu.core_type = #tpu.core_type<tc>, window_params = [{transform_indices = @transform_0, window_bounds = array<i64: 1, 4, 256>}, {pipeline_mode = #tpu.pipeline_mode<synchronous>, transform_indices = @transform_1, window_bounds = array<i64: 4, 128>}, {pipeline_mode = #tpu.pipeline_mode<synchronous>, transform_indices = @transform_2, window_bounds = array<i64: 1, 128>}, {transform_indices = @transform_3, window_bounds = array<i64: 1, 1, 128>}]} {
    %c0_i32 = arith.constant 0 : i32
    %0 = arith.cmpi eq, %arg1, %c0_i32 : i32
    %1 = arith.extui %0 : i1 to i32
    %c0_i32_0 = arith.constant 0 : i32
    %2 = arith.cmpi ne, %1, %c0_i32_0 : i32
    scf.if %2 {
      %cst = arith.constant 0.000000e+00 : f32
      %14 = vector.broadcast %cst : f32 to vector<1x4x128xf32>
      %c0_19 = arith.constant 0 : index
      %c0_20 = arith.constant 0 : index
      %c0_21 = arith.constant 0 : index
      %15 = vector.load %arg6[%c0_19, %c0_20, %c0_21] : memref<1x4x128xf32, #tpu.memory_space<vmem>>, vector<1x4x128xf32>
      tpu.vector_store %arg6[%c0_19, %c0_20, %c0_21], %14 {strides = array<i32>} : memref<1x4x128xf32, #tpu.memory_space<vmem>>, vector<1x4x128xf32>,
    } else {
    }
    %c0 = arith.constant 0 : index
    %c0_1 = arith.constant 0 : index
    %c0_2 = arith.constant 0 : index
    %3 = vector.load %arg2[%c0, %c0_1, %c0_2] : memref<1x4x256xf32, #tpu.memory_space<vmem>>, vector<1x4x128xf32>
    %c0_3 = arith.constant 0 : index
    %c0_4 = arith.constant 0 : index
    %c0_5 = arith.constant 0 : index
    %4 = vector.load %arg6[%c0_3, %c0_4, %c0_5] : memref<1x4x128xf32, #tpu.memory_space<vmem>>, vector<1x4x128xf32>
    %5 = arith.addf %4, %3 : vector<1x4x128xf32>
    %c0_6 = arith.constant 0 : index
    %c0_7 = arith.constant 0 : index
    %c0_8 = arith.constant 0 : index
    %6 = vector.load %arg6[%c0_6, %c0_7, %c0_8] : memref<1x4x128xf32, #tpu.memory_space<vmem>>, vector<1x4x128xf32>
    tpu.vector_store %arg6[%c0_6, %c0_7, %c0_8], %5 {strides = array<i32>} : memref<1x4x128xf32, #tpu.memory_space<vmem>>, vector<1x4x128xf32>,
    %c0_9 = arith.constant 0 : index
    %c0_10 = arith.constant 0 : index
    %c128 = arith.constant 128 : index
    %7 = vector.load %arg2[%c0_9, %c0_10, %c128] : memref<1x4x256xf32, #tpu.memory_space<vmem>>, vector<1x4x128xf32>
    %c0_11 = arith.constant 0 : index
    %c0_12 = arith.constant 0 : index
    %c0_13 = arith.constant 0 : index
    %8 = vector.load %arg6[%c0_11, %c0_12, %c0_13] : memref<1x4x128xf32, #tpu.memory_space<vmem>>, vector<1x4x128xf32>
    %9 = arith.addf %8, %7 : vector<1x4x128xf32>
    %c0_14 = arith.constant 0 : index
    %c0_15 = arith.constant 0 : index
    %c0_16 = arith.constant 0 : index
    %10 = vector.load %arg6[%c0_14, %c0_15, %c0_16] : memref<1x4x128xf32, #tpu.memory_space<vmem>>, vector<1x4x128xf32>
    tpu.vector_store %arg6[%c0_14, %c0_15, %c0_16], %9 {strides = array<i32>} : memref<1x4x128xf32, #tpu.memory_space<vmem>>, vector<1x4x128xf32>,
    %c0_i32_17 = arith.constant 0 : i32
    %11 = arith.cmpi eq, %arg1, %c0_i32_17 : i32
    %12 = arith.extui %11 : i1 to i32
    %c0_i32_18 = arith.constant 0 : i32
    %13 = arith.cmpi ne, %12, %c0_i32_18 : i32
    scf.if %13 {
      %c0_19 = arith.constant 0 : index
      %c0_20 = arith.constant 0 : index
      %c0_21 = arith.constant 0 : index
      %14 = vector.load %arg6[%c0_19, %c0_20, %c0_21] : memref<1x4x128xf32, #tpu.memory_space<vmem>>, vector<1x4x128xf32>
      %cst = arith.constant dense<0.000000e+00> : vector<1x4xf32>
      %15 = vector.multi_reduction <add>, %14, %cst [2] : vector<1x4x128xf32> to vector<1x4xf32>
      %cst_22 = arith.constant 3.906250e-03 : f32
      %16 = vector.broadcast %cst_22 : f32 to vector<1x4xf32>
      %17 = arith.mulf %15, %16 : vector<1x4xf32>
      %18 = arith.truncf %17 : vector<1x4xf32> to vector<1x4xbf16>
      %c0_23 = arith.constant 0 : index
      %c0_24 = arith.constant 0 : index
      %19 = vector.load %arg3[%c0_23, %c0_24] : memref<4x128xbf16, #tpu.memory_space<vmem>>, vector<4x128xbf16>
      %cst_25 = arith.constant dense<0.000000e+00> : vector<1x128xf32>
      %20 = tpu.matmul %18, %19, %cst_25 {dimension_numbers = #tpu.dot_dimension_numbers<[1], [0], [0], [1], [0, 0, 1, 1], [], []>} : vector<1x4xbf16>, vector<4x128xbf16>, vector<1x128xf32> -> vector<1x128xf32>
      %c0_26 = arith.constant 0 : index
      %c0_27 = arith.constant 0 : index
      %21 = vector.load %arg4[%c0_26, %c0_27] : memref<1x128xf32, #tpu.memory_space<vmem>>, vector<1x128xf32>
      %22 = arith.addf %20, %21 : vector<1x128xf32>
      %c0_28 = arith.constant 0 : index
      %c0_29 = arith.constant 0 : index
      %c0_30 = arith.constant 0 : index
      %23 = vector.load %arg5[%c0_28, %c0_29, %c0_30] : memref<1x1x128xf32, #tpu.memory_space<vmem>>, vector<1x1x128xf32>
      %24 = vector.shape_cast %23 : vector<1x1x128xf32> to vector<1x128xf32>
      %25 = vector.shape_cast %22 : vector<1x128xf32> to vector<1x1x128xf32>
      tpu.vector_store %arg5[%c0_28, %c0_29, %c0_30], %25 {strides = array<i32>} : memref<1x1x128xf32, #tpu.memory_space<vmem>>, vector<1x1x128xf32>,
    } else {
    }
    return
  }
  func.func @transform_0(%arg0: i32, %arg1: i32) -> (i32, i32, i32) {
    %c0_i32 = arith.constant 0 : i32
    %c0_i32_0 = arith.constant 0 : i32
    return %arg0, %c0_i32, %arg1 : i32, i32, i32
  }
  func.func @transform_1(%arg0: i32, %arg1: i32) -> (i32, i32) {
    %c0_i32 = arith.constant 0 : i32
    %c0_i32_0 = arith.constant 0 : i32
    %c0_i32_1 = arith.constant 0 : i32
    return %c0_i32, %c0_i32_0 : i32, i32
  }
  func.func @transform_2(%arg0: i32, %arg1: i32) -> (i32, i32) {
    %c0_i32 = arith.constant 0 : i32
    %c0_i32_0 = arith.constant 0 : i32
    %c0_i32_1 = arith.constant 0 : i32
    return %c0_i32, %c0_i32_0 : i32, i32
  }
  func.func @transform_3(%arg0: i32, %arg1: i32) -> (i32, i32, i32) {
    %c0_i32 = arith.constant 0 : i32
    %c0_i32_0 = arith.constant 0 : i32
    %c0_i32_1 = arith.constant 0 : i32
    return %arg0, %c0_i32, %c0_i32_0 : i32, i32, i32
  }
}

</mosaic_0001>

<bundles_post_ra>
// kernel: tpu_custom_call.1
= control target key start
LH: loop header
LB: loop body
LE: loop exit
PB: predicated region body
PF: predicated region fallthrough
CT: control target
= control target key end

     0   :  { %8 = vsyncpa [#allocation4], 0  ;;  %s841_s0 = inlined_call_operand.hbm [shape: f32[2,4,256], index: 0, kind: input, shape index: {}]   ;;  %s842_s1 = inlined_call_operand.hbm [shape: bf16[4,128], index: 1, kind: input, shape index: {}]   ;;  %s843_s2 = inlined_call_operand.vmem [shape: f32[1,128], index: 2, kind: input, shape index: {}]   ;;  %s844_s3 = inlined_call_operand.hbm [shape: f32[2,1,128], index: 3, kind: output, shape index: {}]  }
   0x1   :  { %10 = vsyncpa [#allocation4 + $0x1], 0 }
   0x2   :  { %11 = vsyncpa [#allocation7], 0 }
   0x3   :  { %12 = vsyncpa [#allocation5], 0 }
   0x4   :  { %14 = vsyncpa [#allocation5 + $0x1], 0  ;;  %s664_s12 = smov 0   ;;  %s666_s13 = smov 0  }
   0x5   :  { %s668_s14 = smov 0   ;;  %s670_s15 = smov 0  }
   0x6   :  { %s672_s16 = smov 0   ;;  %s674_s17 = smov 0  }
   0x7 LB: > { %s400_s18 = sadd.s32 4294967295, %s637_s17   ;;  %s401_s19 = sadd.s32 4294967294, %s637_s17   ;;  %s637_s17 = sphi %s674_s17, %s20_s17   ;;  %s633_s16 = sphi %s672_s16, %s861_s16   ;;  %s629_s15 = sphi %s670_s15, %s860_s15   ;;  %s625_s14 = sphi %s668_s14, %s859_s14   ;;  %s621_s13 = sphi %s666_s13, %s858_s13   ;;  %s617_s12 = sphi %s664_s12, %s857_s12  }
   0x8   : > { %p54_p0 = scmp.ne.s32.totalorder %s621_s13, %s617_s12  ;;  %p698_p1 = scmp.eq.s32.totalorder %s400_s18, 0 }
   0x9   : > { %p702_p2 = scmp.eq.s32.totalorder %s400_s18, 1  ;;  %p126_p3 = scmp.eq.s32.totalorder %s401_s19, 1 }
   0xa   : > { %p708_p4 = por %p698_p1, %p54_p0  ;;  %p402_p5 = scmp.ge.s32.totalorder %s637_s17, 1 }
   0xb   : > { %p713_p6 = por %p126_p3, %p54_p0  ;;  %p133_p7 = scmp.lt.s32.totalorder %s637_s17, 3 }
   0xc   : > { %s848_s22 = scalar_select %p708_p4, 1, 0 }
   0xd   : > { %s849_s23 = scalar_select %p713_p6, 1, 0 }
   0xe   : > { %p718_p8 = pnand %p402_p5, %p133_p7  ;;  %s639_s25 = smov [#allocation6]  }
   0xf   : > { %s146_s26 = sshll.u32 %s639_s25, 4  ;;  %s32_s28 = sadd.s32 1, %s633_s16  ;;  %s147_s26 = int_to_ptr.vmem [resolvable:$true] %s146_s26 }
  0x10   : > { %p432_p10 = pneg %p718_p8  ;;  %s41_s29 = sadd.s32 1, %s625_s14 }
  0x11   : > { %p34_p12 = scmp.ge.s32.totalorder %s32_s28, 2  ;;  %s510_s30 = scalar_lea.vmem %s147_s26, 32 }
  0x12   : > { %p727_p11 = pnand %p432_p10, %p698_p1  ;;  %p511_p0 = scmp.ne.s32.totalorder %s147_s26, %s510_s30 }
  0x13   : > { %p518_p7 = scmp.lt.s32.totalorder %s147_s26, %s147_s26  ;;  %p519_p6 = scmp.lt.s32.totalorder %s510_s30, %s510_s30 }
  0x14   : > { %p501_p13 = pneg %p727_p11 }
  0x15   : > { %p520_p9 = por %p519_p6, %p518_p7 }
  0x16   : > { %p513_p3 = pnand %p511_p0, %p501_p13 }
  0x18   : > { %p514_p5 = pneg %p513_p3 }
  0x1a   : > { %p521_p4 = pnand %p520_p9, %p514_p5 }
  0x1c   : > { %524 = shalt.err (!%p521_p4)
}
  0x1d   : > { %435 = dma.hbm_to_vmem [thread:$0]  (!%p727_p11), %s842_s1, 32, %s147_s26, [#allocation7]  }
  0x1e   : > { %s863_s28 = smov (%p34_p12, %s32_s28), 0  ;;  %p48_p6 = scmp.ne.s32.totalorder %s625_s14, %s621_s13 }
  0x1f   : > { %p49_p4 = scmp.eq.s32.totalorder %s637_s17, 0  ;;  %s36_s6 = ssub.s32 %s633_s16, %s863_s28 }
  0x20   : > { %p445_p9 = scmp.lt.s32.totalorder %s637_s17, 2  ;;  %p39_p10 = scmp.eq.s32.totalorder %s36_s6, 0 }
  0x21   : > { %p50_p13 = por %p49_p4, %p48_p6  ;;  %p750_p0 = por %p702_p2, %p48_p6 }
  0x22   : > { %s160_s8 = sand.u32 1, %s625_s14   ;;  %s415_s11 = sshll.u32 %s633_s16, 7 }
  0x23   : > { %s756_s9 = scalar_select %p39_p10, %s625_s14, %s41_s29  }
  0x24   : > { %s405_s10 = sshll.u32 %s160_s8, 3  ;;  %s172_s25 = scalar_lea.hbm %s841_s0, %s415_s11 }
  0x25   : > { %s164_s26 = scalar_lea.vmem [#allocation3], %s405_s10  ;;  %p762_p11 = pnand %p445_p9, %p50_p13 }
  0x26   : > { %s174_s27 = sshll.u32 %s164_s26, 4  ;;  %s161_s21 = scalar_lea.sflag [#allocation4], %s160_s8  ;;  %s175_s27 = int_to_ptr.vmem [resolvable:$true] %s174_s27 }
  0x27   : > { %p527_p2 = pneg %p762_p11  ;;  %s538_s4 = scalar_lea.vmem %s175_s27, 128 }
  0x28   : > { %p539_p12 = scmp.ne.s32.totalorder %s175_s27, %s538_s4  ;;  %s640_s29 = smov [#allocation3]  }
  0x29   : > { %s543_s5 = sshll.u32 %s640_s29, 4  ;;  %s544_s5 = int_to_ptr.vmem [resolvable:$false] %s543_s5 }
  0x2a   : > { %p541_p3 = pnand %p539_p12, %p527_p2  ;;  %s545_s6 = scalar_lea.vmem %s544_s5, 256 }
  0x2b   : > { %p546_p7 = scmp.lt.s32.totalorder %s175_s27, %s544_s5  ;;  %p547_p6 = scmp.lt.s32.totalorder %s545_s6, %s538_s4 }
  0x2c   : > { %p542_p5 = pneg %p541_p3 }
  0x2d   : > { %p548_p4 = por %p547_p6, %p546_p7 }
  0x2f   : > { %p549_p10 = pnand %p548_p4, %p542_p5 }
  0x31   : > { %552 = shalt.err (!%p549_p10)
}
  0x32   : > { %439 = dma.hbm_to_vmem [thread:$0]  (!%p762_p11), %s172_s25, 128, %s175_s27, %s161_s21  }
  0x33   : > { %183 = sbr.rel (%p718_p8) target bundleno = 446 (0x1be), region = 32  ;;  %s773_s8 = sand.u32 (!%p718_p8), 1, %s621_s13  }
  0x34   : > { %s409_s10 = sshll.u32 (!%p718_p8), %s773_s8, 3  ;;  %s186_s11 = scalar_lea.sflag (!%p718_p8), [#allocation4], %s773_s8 }
  0x35   : > { %s189_s18 = scalar_lea.vmem (!%p718_p8), [#allocation3], %s409_s10  ;;  %p854_p9 = scmp.ne.s32.totalorder (!%p718_p8), %s848_s22, 0 }
  0x38   : > { %604 = dma.done.wait (%p854_p9), %s186_s11, 128  }
  0x39   : > { %606 = vsyncadd (%p854_p9), %s186_s11, 4294967168 }
  0x3a   : > { %608 = dma.done.wait (%p698_p1), [#allocation7], 32  }
  0x3b   : > { %610 = vsyncadd (%p698_p1), [#allocation7], 4294967264  ;;  %v641_v0 = vmov 0.0   ;;  %v222_v1 = vld [vmem:[%s189_s18] sm:$0xf]  ;;  %vm234_vm0 = vcmask 1043456   ;;  %v244_v11 = vlaneseq }
  0x3c   : > { %221 = vst [vmem:[#allocation2] sm:$0xf] %v641_v0  ;;  %418 = vmatprep.subr.bf16.mxu0 %v641_v0  ;;  %v226_v4 = vld [vmem:[%s189_s18 + $0x4] sm:$0xf]  ;;  %v240_v9 = vld [vmem:[#allocation6] sm:$0x3] }
  0x3d   : > { %vm255_vm1 = vcmask 1041408   ;;  %vm642_vm2 = vmmov 0   ;;  %v245_v12 = vand.u32 127, %v244_v11  ;;  %v247_v13 = vshrl.u32 %v244_v11, 7  ;;  %v241_v21 = vld [vmem:[%s843_s2] sm:$0x1] }
  0x3e   : > { %v257_v10 = vsel %vm255_vm1, %v240_v9, 0  ;;  %420 = vmatprep.mubr.msk.bf16.mxu0 %vm642_vm2, %v641_v0  ;;  %vm251_vm3 = vcmask 31744   ;;  %s412_s24 = sshll.u32 %s629_s15, 4  ;;  %s214_s19 = scalar_lea.vmem [#allocation8], %s773_s8 }
  0x3f   : > { %419 = vmatpush3.bf16.msra.mxu0 %v257_v10  ;;  %v248_v17 = vsub.s32 %v245_v12, %v247_v13  ;;  %s313_s25 = sshll.u32 %s214_s19, 4  ;;  %s793_s30 = scalar_lea.hbm %s844_s3, %s412_s24  ;;  %s795_s25 = int_to_ptr.vmem [resolvable:$true] %s313_s25 }
  0x40   : > { %s301_s21 = scalar_lea.sflag [#allocation5], %s773_s8  ;;  %s553_s4 = scalar_lea.vmem %s795_s25, 16 }
  0x41   : > { %p554_p1 = scmp.ne.s32.totalorder %s795_s25, %s553_s4  ;;  %s643_s15 = smov [#allocation8]  }
  0x42   : > { %s557_s29 = sshll.u32 %s643_s15, 4  ;;  %s558_s29 = int_to_ptr.vmem [resolvable:$false] %s557_s29 }
  0x43   : > { %v223_v2 = vld [vmem:[#allocation2] sm:$0xf]  ;;  %p555_p8 = pnand %p554_p1, %p750_p0  ;;  %s559_s5 = scalar_lea.vmem %s558_s29, 32 }
  0x44   : > { %v224_v3 = vadd.f32 %v223_v2, %v222_v1  ;;  %p560_p11 = scmp.lt.s32.totalorder %s795_s25, %s558_s29  ;;  %p561_p2 = scmp.lt.s32.totalorder %s559_s5, %s553_s4 }
  0x45   : > { %p556_p13 = pneg %p555_p8 }
  0x46   : > { %225 = vst [vmem:[#allocation2] sm:$0xf] %v224_v3  ;;  %p562_p12 = por %p561_p2, %p560_p11 }
  0x48   : > { %p563_p3 = pnand %p562_p12, %p556_p13 }
  0x4d   : > { %v227_v5 = vld [vmem:[#allocation2] sm:$0xf] }
  0x4e   : > { %v228_v6 = vadd.f32 %v227_v5, %v226_v4 }
  0x50   : > { %229 = vst [vmem:[#allocation2] sm:$0xf] %v228_v6 }
  0x57   : > { %v233_v7 = vld [vmem:[#allocation2] sm:$0xf] }
  0x58   : > { %v235_v8 = vsel %vm234_vm0, %v233_v7, 0.0 }
  0x59   : > { %236 = vadd.xlane.f32.xlu0 %v235_v8 }
  0xe2   : > { %v237_v14 = vpop.xlane.xlu0 %236 }
  0xe3   : > { %v238_v15 = vmul.f32 0.00390625, %v237_v14 }
  0xe5   : > { %v239_v16 = vpack.c.bf16 %v238_v15, %v238_v15 }
  0xe7   : > { %v243_v18 = vunpack.c.l.b16 %v239_v16 }
  0xe9   : > { %v249_v19 = vrot.slane %v243_v18, %v248_v17 }
  0xeb   : > { %v250_v20 = vpack.c.b16 %v249_v19, %v249_v19 }
  0xed   : > { %421 = vmatmul.mubr.msk.bf16.vlgmr.msra.gmra.mxu0 %vm251_vm3, %v250_v20 }
 0x1ad   : > { %v293_v22 = vpop.f32.mrf.mxu0 }
 0x1ae   : > { %v294_v23 = vadd.f32 %v293_v22, %v241_v21 }
 0x1af   : > { %v422_v24 = vpop.f32.mrf.mxu0 }
 0x1b0   : > { %299 = vst [vmem:[%s214_s19] sm:$0x1] %v294_v23 }
 0x1b1   : > { %v296_v25 = vpop.f32.mrf.mxu0 }
 0x1b2   : > { %566 = shalt.err (!%p563_p3)
}
 0x1b3   : > { %s567_s6 = scalar_lea.hbm %s793_s30, 16  ;;  %s571_s11 = scalar_lea.hbm %s844_s3, 32 }
 0x1b4   : > { %p568_p5 = scmp.ne.s32.totalorder %s793_s30, %s567_s6  ;;  %p572_p4 = scmp.lt.s32.totalorder %s793_s30, %s844_s3 }
 0x1b5   : > { %p573_p10 = scmp.lt.s32.totalorder %s571_s11, %s567_s6 }
 0x1b6   : > { %p569_p7 = pnand %p568_p5, %p750_p0 }
 0x1b7   : > { %p574_p9 = por %p573_p10, %p572_p4 }
 0x1b8   : > { %p570_p6 = pneg %p569_p7 }
 0x1ba   : > { %p575_p1 = pnand %p574_p9, %p570_p6 }
 0x1bc   : > { %578 = shalt.err (!%p575_p1)
}
 0x1bd   : > { %430 = dma.vmem_to_hbm [thread:$0]  (%p750_p0), %s795_s25, 16, %s793_s30, %s301_s21   ;;  %v423_v26 = vpop.f32.mrf.mxu0 }
 0x1be PF: > { %s325_s22 = sand.u32 1, %s617_s12   ;;  %p855_p8 = scmp.ne.s32.totalorder %s849_s23, 0 }
 0x1bf   : > { %p856_p13 = scmp.ge.s32.totalorder %s637_s17, 2  ;;  %s326_s24 = scalar_lea.sflag [#allocation5], %s325_s22 }
 0x1c1   : > { %p441_p11 = pnand %p856_p13, %p855_p8 }
 0x1c3   : > { %p442_p2 = pneg %p441_p11 }
 0x1c5   : > { %612 = dma.done.wait (%p442_p2), %s326_s24, 16  }
 0x1c6   : > { %614 = vsyncadd (%p442_p2), %s326_s24, 4294967280  ;;  %s20_s17 = sadd.s32 1, %s637_s17   ;;  %s857_s12 = smov %s621_s13 }
 0x1c7   : > { %p17_p12 = scmp.ge.s32.totalorder %s20_s17, 4   ;;  %s858_s13 = smov %s625_s14 }
 0x1c8   : > { %s859_s14 = smov %s756_s9  ;;  %s860_s15 = smov %s633_s16 }
 0x1c9   : > { %s861_s16 = smov %s863_s28  ;;  %19 = sbr.rel (!%p17_p12) target bundleno = 7 (0x7), region = 89 }
 0x1ce   :  { %330 = vsyncpa [#allocation4], 1 }
 0x1cf   :  { %332 = vsyncpa [#allocation4 + $0x1], 1 }
 0x1d0   :  { %333 = vsyncpa [#allocation7], 1 }
 0x1d1   :  { %334 = vsyncpa [#allocation5], 1 }
 0x1d2   :  { %336 = vsyncpa [#allocation5 + $0x1], 1 }

</bundles_post_ra>
